<compile_context>
chip_gen: v7x
topology: tpu7x:2x2x1
jax: 0.10.0
libtpu: 0.0.40
codegen_flags: <defaults>
</compile_context>

<pallas_src>
import jax
import jax.numpy as jnp
from jax.experimental import pallas as pl
from jax.experimental.pallas import tpu as pltpu


def _normalize_kernel(scale_ref, bias_ref, x_ref, o_ref):
    # scale_ref/bias_ref: (TR, 1) f32 ; x_ref: (TR, TCOL) input dtype ; o_ref: f32.
    x = x_ref[...].astype(jnp.float32)
    o_ref[...] = x * scale_ref[...] + bias_ref[...]


# Row-tile cap: multiple of 8 (f32), 16 (bf16) and 32 (int8/uint8) sublane
# packing, so input reads stay dense regardless of the source dtype.
_TROW_CAP = 256
# Target ~2 MiB of f32 output per grid step (2-4 MiB in+out per block).
_BLOCK_OUT_BYTES = 2 << 20


def _row_tile(R):
    # Full extent is always a legal sublane block; otherwise a fixed multiple
    # of 8/16/32 with a cdiv grid (Pallas clips the padded edge block).
    return R if R <= _TROW_CAP else _TROW_CAP


def _col_tile(HW, trow):
    # Lane tile sized so the f32 output block is ~_BLOCK_OUT_BYTES; multiple
    # of 128 keeps stores unmasked and lane-dense.  Full extent if HW fits.
    target = max(128, (_BLOCK_OUT_BYTES // 4) // max(trow, 1))
    target = (target // 128) * 128
    return HW if HW <= target else target


def dino_normalize(x, mean, std):
    """(x.float() - mean[None,:,None,None]) / std[None,:,None,None], NCHW."""
    if x.ndim != 4 or x.shape[1] != 3:
        raise ValueError("Input tensor must be in the shape (B, 3, H, W)")
    B, C, H, W = x.shape
    HW = H * W
    R = B * C

    mean = jnp.asarray(mean, dtype=jnp.float32)
    std = jnp.asarray(std, dtype=jnp.float32)
    # (x - m) / s == x * (1/s) + (-m/s): broadcasted FMA instead of divide
    # (~1 ulp difference vs the divide form -- intentional; std=0 -> inf matches).
    scale = 1.0 / std
    bias = -mean * scale
    # Row r of the flattened (B*C, H*W) view corresponds to channel r % C.
    row_scale = jnp.tile(scale, B).reshape(R, 1)
    row_bias = jnp.tile(bias, B).reshape(R, 1)

    # Lane-dense flattened view (contiguous for NCHW -> free reshape).
    x2 = x.reshape(R, HW)
    itemsize = jnp.dtype(x.dtype).itemsize

    trow = _row_tile(R)
    tcol = _col_tile(HW, trow)
    grid = (pl.cdiv(R, trow), pl.cdiv(HW, tcol))

    # Explicit scoped-VMEM budget: double-buffered in+out blocks plus slack,
    # so every generation (v5e 16 MiB scoped default, v7x 64 MiB physical)
    # compiles without external flag tuning.
    block_bytes = trow * tcol * (4 + itemsize) + 2 * trow * 4
    vmem_limit = int(min(max(2 * block_bytes + (4 << 20), 16 << 20), 48 << 20))

    out_flat = pl.pallas_call(
        _normalize_kernel,
        out_shape=jax.ShapeDtypeStruct((R, HW), jnp.float32),
        grid=grid,
        in_specs=[
            pl.BlockSpec((trow, 1), lambda i, j: (i, 0)),     # per-row scale
            pl.BlockSpec((trow, 1), lambda i, j: (i, 0)),     # per-row bias
            pl.BlockSpec((trow, tcol), lambda i, j: (i, j)),  # x tile
        ],
        out_specs=pl.BlockSpec((trow, tcol), lambda i, j: (i, j)),
        compiler_params=pltpu.CompilerParams(
            dimension_semantics=("parallel", "parallel"),
            vmem_limit_bytes=vmem_limit,
        ),
        cost_estimate=pl.CostEstimate(
            flops=2 * x.size,
            transcendentals=0,
            bytes_accessed=x.size * itemsize + x.size * 4,
        ),
    )(row_scale, row_bias, x2)

    return out_flat.reshape(B, C, H, W)


if __name__ == "__main__":
    # Deterministic parameters (module defaults from __init__).
    mean = [0.485, 0.456, 0.406]
    std = [0.229, 0.224, 0.225]

    # Small example input consistent with the module: B=2, C=3 (required), H=W=16.
    key = jax.random.PRNGKey(0)
    x = jax.random.uniform(key, (2, 3, 16, 16), dtype=jnp.float32)

    out = dino_normalize(x, mean, std)
    out = jax.block_until_ready(out)

    # Pure-JAX reference check (divide form; kernel uses reciprocal-multiply).
    mean_a = jnp.asarray(mean, jnp.float32).reshape(1, 3, 1, 1)
    std_a = jnp.asarray(std, jnp.float32).reshape(1, 3, 1, 1)
    ref = (x.astype(jnp.float32) - mean_a) / std_a
    assert out.shape == ref.shape and out.dtype == jnp.float32
    assert jnp.allclose(out, ref, atol=1e-5, rtol=1e-5)

    # Extra robustness check: a non-128-multiple spatial size (previously the
    # fallback path) now runs through the same fixed-tile cdiv grid.
    x2 = jax.random.uniform(jax.random.PRNGKey(1), (2, 3, 18, 22), dtype=jnp.float32)
    out2 = jax.block_until_ready(dino_normalize(x2, mean, std))
    ref2 = (x2.astype(jnp.float32) - mean_a) / std_a
    assert jnp.allclose(out2, ref2, atol=1e-5, rtol=1e-5)

    print("KERNEL_OK")
</pallas_src>

<mosaic_0001>
module attributes {stable_mosaic.version = 11 : i64} {
  func.func @_normalize_kernel(%arg0: i32, %arg1: i32, %arg2: memref<6x1xf32, #tpu.memory_space<vmem>>, %arg3: memref<6x1xf32, #tpu.memory_space<vmem>>, %arg4: memref<6x256xf32, #tpu.memory_space<vmem>>, %arg5: memref<6x256xf32, #tpu.memory_space<vmem>>) attributes {dimension_semantics = [#tpu.dimension_semantics<parallel>, #tpu.dimension_semantics<parallel>], iteration_bounds = array<i64: 1, 1>, scalar_prefetch = 0 : i64, scratch_operands = 0 : i64, tpu.core_type = #tpu.core_type<tc>, window_params = [{transform_indices = @transform_0, window_bounds = array<i64: 6, 1>}, {transform_indices = @transform_1, window_bounds = array<i64: 6, 1>}, {transform_indices = @transform_2, window_bounds = array<i64: 6, 256>}, {transform_indices = @transform_3, window_bounds = array<i64: 6, 256>}]} {
    %c0 = arith.constant 0 : index
    %c0_0 = arith.constant 0 : index
    %0 = vector.load %arg4[%c0, %c0_0] : memref<6x256xf32, #tpu.memory_space<vmem>>, vector<6x256xf32>
    %c0_1 = arith.constant 0 : index
    %c0_2 = arith.constant 0 : index
    %1 = vector.load %arg2[%c0_1, %c0_2] : memref<6x1xf32, #tpu.memory_space<vmem>>, vector<6x1xf32>
    %2 = vector.broadcast %1 : vector<6x1xf32> to vector<6x256xf32>
    %3 = arith.mulf %0, %2 : vector<6x256xf32>
    %c0_3 = arith.constant 0 : index
    %c0_4 = arith.constant 0 : index
    %4 = vector.load %arg3[%c0_3, %c0_4] : memref<6x1xf32, #tpu.memory_space<vmem>>, vector<6x1xf32>
    %5 = vector.broadcast %4 : vector<6x1xf32> to vector<6x256xf32>
    %6 = arith.addf %3, %5 : vector<6x256xf32>
    %c0_5 = arith.constant 0 : index
    %c0_6 = arith.constant 0 : index
    %7 = vector.load %arg5[%c0_5, %c0_6] : memref<6x256xf32, #tpu.memory_space<vmem>>, vector<6x256xf32>
    tpu.vector_store %arg5[%c0_5, %c0_6], %6 {strides = array<i32>} : memref<6x256xf32, #tpu.memory_space<vmem>>, vector<6x256xf32>,
    return
  }
  func.func @transform_0(%arg0: i32, %arg1: i32) -> (i32, i32) {
    %c0_i32 = arith.constant 0 : i32
    %c0_i32_0 = arith.constant 0 : i32
    return %arg0, %c0_i32 : i32, i32
  }
  func.func @transform_1(%arg0: i32, %arg1: i32) -> (i32, i32) {
    %c0_i32 = arith.constant 0 : i32
    %c0_i32_0 = arith.constant 0 : i32
    return %arg0, %c0_i32 : i32, i32
  }
  func.func @transform_2(%arg0: i32, %arg1: i32) -> (i32, i32) {
    %c0_i32 = arith.constant 0 : i32
    return %arg0, %arg1 : i32, i32
  }
  func.func @transform_3(%arg0: i32, %arg1: i32) -> (i32, i32) {
    %c0_i32 = arith.constant 0 : i32
    return %arg0, %arg1 : i32, i32
  }
}

</mosaic_0001>

<bundles_post_ra>
// kernel: tpu_custom_call.1
= control target key start
LH: loop header
LB: loop body
LE: loop exit
PB: predicated region body
PF: predicated region fallthrough
CT: control target
= control target key end

     0   :  { %v76_v1 = vmov 0   ;;  %s122_s0 = inlined_call_operand.vmem [shape: f32[6,1], index: 0, kind: input, shape index: {}]   ;;  %s123_s1 = inlined_call_operand.vmem [shape: f32[6,1], index: 1, kind: input, shape index: {}]   ;;  %s124_s2 = inlined_call_operand.vmem [shape: f32[6,256], index: 2, kind: input, shape index: {}]   ;;  %s125_s3 = inlined_call_operand.hbm [shape: f32[6,256], index: 3, kind: output, shape index: {}]  }
   0x1   :  { %v17_v0 = vld [vmem:[%s122_s0] sm:$0x3f]  ;;  %51 = vset.pattern.permute.xlu0 %v76_v1 }
   0x2   :  { %8 = vsyncpa [#allocation3], 0  ;;  %20 = vperm.xlu0 %51, %v17_v0   ;;  %v25_v2 = vld [vmem:[%s123_s1] sm:$0x3f]  ;;  %v16_v5 = vld [vmem:[%s124_s2 + $0x8] sm:$0x3f] }
   0x3   :  { %v15_v4 = vld [vmem:[%s124_s2] sm:$0x3f]  ;;  %s77_s20 = smov [#allocation2]  }
   0x4   :  { %s41_s0 = sshll.u32 %s77_s20, 4  ;;  %s42_s0 = int_to_ptr.vmem [resolvable:$true] %s41_s0 }
   0x5   :  { %s52_s1 = scalar_lea.vmem %s42_s0, 256  ;;  %p57_p1 = scmp.lt.s32.totalorder %s42_s0, %s42_s0 }
   0x6   :  { %28 = vperm.xlu0 %51, %v25_v2   ;;  %p53_p0 = scmp.ne.s32.totalorder %s42_s0, %s52_s1  ;;  %p58_p2 = scmp.lt.s32.totalorder %s52_s1, %s52_s1 }
   0x8   :  { %p59_p3 = por %p58_p2, %p57_p1 }
   0xa   :  { %p60_p4 = pnand %p59_p3, %p53_p0 }
  0x81   :  { %v21_v3 = vpop.permute.xlu0 %20 }
  0x82   :  { %v23_v6 = vmul.f32 %v21_v3, %v15_v4  ;;  %v24_v7 = vmul.f32 %v21_v3, %v16_v5 }
  0x85   :  { %v29_v8 = vpop.permute.xlu0 %28 }
  0x86   :  { %v31_v9 = vadd.f32 %v29_v8, %v23_v6  ;;  %v32_v10 = vadd.f32 %v29_v8, %v24_v7 }
  0x88   :  { %33 = vst [vmem:[#allocation2] sm:$0x3f] %v31_v9  ;;  %34 = vst [vmem:[#allocation2 + $0x8] sm:$0x3f] %v32_v10 }
  0x89   :  { %63 = shalt.err (!%p60_p4)
}
  0x8a   :  { %s64_s2 = scalar_lea.hbm %s125_s3, 256 }
  0x8b   :  { %p65_p5 = scmp.ne.s32.totalorder %s125_s3, %s64_s2  ;;  %p68_p6 = scmp.lt.u32.totalorder %s64_s2, %s125_s3 }
  0x8d   :  { %p70_p7 = pnand %p68_p6, %p65_p5 }
  0x8f   :  { %73 = shalt.err (!%p70_p7)
}
  0x90   :  { %44 = dma.vmem_to_hbm [thread:$0]  %s42_s0, 256, %s125_s3, [#allocation3]  }
  0x91   :  { %74 = dma.done.wait [#allocation3], 256  }
  0x92   :  { %75 = vsyncadd [#allocation3], 4294967040 }
  0x93   :  { %48 = vsyncpa [#allocation3], 1 }

</bundles_post_ra>
